<compile_context>
chip_gen: v7x
topology: tpu7x:2x2x1
jax: 0.10.0
libtpu: 0.0.40
codegen_flags: <defaults>
</compile_context>

<pallas_src>
import jax
import jax.numpy as jnp
from jax import lax
from jax.experimental import pallas as pl
from jax.experimental.pallas import tpu as pltpu


# ------------------------------ wrapper helpers -------------------------------

def _col_selectors(n):
    # (n, n//2) 0/1 matrices selecting even / odd lanes via matmul (exact in f32).
    i = lax.broadcasted_iota(jnp.int32, (n, n // 2), 0)
    j = lax.broadcasted_iota(jnp.int32, (n, n // 2), 1)
    return (i == 2 * j).astype(jnp.float32), (i == 2 * j + 1).astype(jnp.float32)


def _banded_conv_weight(w, wout):
    """w: (COUT, CIN, 3, 3) -> (3, CIN*wout, COUT*wout) banded matrices.

    out[kh, ci*wout + a, co*wout + b] = w[co, ci, kh, a - b + 1] (0 outside the
    3-tap window), i.e. "same" column padding is absorbed into the band.
    NOTE: band is O(wout^2) VMEM / ~wout/3x extra MACs; switch to per-tap
    lane-shifted matmuls once wout >= ~64 (free here — MXU idles at this size).
    """
    cout, cin, _, _ = w.shape
    a = jnp.arange(wout)[:, None]
    b = jnp.arange(wout)[None, :]
    sel = jnp.stack([(a - b + 1 == k).astype(w.dtype) for k in range(3)])   # (3,wout,wout)
    wk = jnp.einsum("oihw,wab->hiaob", w, sel)                              # (3,CIN,wout,COUT,wout)
    return wk.reshape(3, cin * wout, cout * wout)


def _row_mask(n_rows, period, lo, hi):
    r = jnp.arange(n_rows)
    m = ((r % period) >= lo) & ((r % period) <= hi)
    return m.astype(jnp.float32)[:, None]


# --------------------------------- forward ------------------------------------

def fe_cnn_1_forward(x, params):
    """x: (N, 1, H, W) float32 (NCHW, like the PyTorch module)."""
    N, cin, H, W = x.shape
    assert cin == 1 and H % 4 == 0 and W % 4 == 0
    C0, C1 = 3, 10
    H2, W2, H4, W4 = H // 2, W // 2, H // 4, W // 4
    eps = 1e-5
    P0 = H + 4                   # per-image row period of the conv0 slab
    P1 = H2 + 2                  # per-image row period of padded conv1 input
    M0 = N * P0 - 2              # rows of the batched conv0 output
    CNT1 = N * P1 - 1            # pooled rows produced by pool #1
    M1 = N * P1 - 2              # rows of the batched conv1 output
    CNT2 = N * (H4 + 1) - 1      # pooled rows produced by pool #2

    def kernel(x_ref, w0k_ref, selB_ref, g_ref, be_ref, rm0_ref,
               pe1_ref, po1_ref, rm1_ref, w1k_ref, b1r_ref, pe2_ref, po2_ref,
               o_ref, c0_scr, h1p_scr, z_scr):
        # ---- conv0: 3 batched banded MXU matmuls over the whole padded slab
        #      (bias dropped: cancels exactly in train-mode BatchNorm) --------
        acc0 = jnp.zeros((M0, C0 * W), jnp.float32)
        for kh in range(3):
            acc0 = acc0 + jnp.dot(x_ref[pl.ds(kh, M0), :], w0k_ref[kh],
                                  preferred_element_type=jnp.float32)
        c0_scr[...] = acc0                                   # single slab store

        # ---- BatchNorm batch stats (single pass, biased variance) -----------
        am = acc0 * rm0_ref[...]                             # mask pad/garbage rows
        col_sum = jnp.sum(am, axis=0, keepdims=True)         # (1, C0*W)
        col_sq = jnp.sum(am * am, axis=0, keepdims=True)     # (1, C0*W)
        inv_cnt = 1.0 / float(N * H * W)
        mean_row = jnp.dot(col_sum, selB_ref[...],
                           preferred_element_type=jnp.float32) * inv_cnt
        ex2_row = jnp.dot(col_sq, selB_ref[...],
                          preferred_element_type=jnp.float32) * inv_cnt
        var_row = ex2_row - mean_row * mean_row
        scale_row = g_ref[...] * lax.rsqrt(var_row + eps)
        shift_row = be_ref[...] - mean_row * scale_row

        # ---- pool #1 with BN affine + ReLU fused into the strided reads -----
        ev = jnp.maximum(c0_scr[pl.ds(0, CNT1, stride=2), :] * scale_row + shift_row, 0.0)
        od = jnp.maximum(c0_scr[pl.ds(1, CNT1, stride=2), :] * scale_row + shift_row, 0.0)
        yr = jnp.maximum(ev, od)                             # (CNT1, C0*W)
        p1 = jnp.maximum(
            jnp.dot(yr, pe1_ref[...], preferred_element_type=jnp.float32),
            jnp.dot(yr, po1_ref[...], preferred_element_type=jnp.float32))
        # Cross-image pooled rows sit exactly on conv1's "same" padding rows:
        # one mask multiply makes them exact zeros -> padded conv1 input.
        h1p_scr[pl.ds(0, CNT1), :] = p1 * rm1_ref[...]
        h1p_scr[pl.ds(CNT1, 1), :] = jnp.zeros((1, C0 * W2), jnp.float32)

        # ---- conv1: 3 batched banded MXU matmuls + bias + ReLU --------------
        z = jnp.zeros((M1, C1 * W2), jnp.float32)
        for kh in range(3):
            z = z + jnp.dot(h1p_scr[pl.ds(kh, M1), :], w1k_ref[kh],
                            preferred_element_type=jnp.float32)
        z_scr[...] = jnp.maximum(z + b1r_ref[...], 0.0)

        # ---- pool #2 + single output store -----------------------------------
        zr = jnp.maximum(z_scr[pl.ds(0, CNT2, stride=2), :],
                         z_scr[pl.ds(1, CNT2, stride=2), :])
        o_ref[...] = jnp.maximum(
            jnp.dot(zr, pe2_ref[...], preferred_element_type=jnp.float32),
            jnp.dot(zr, po2_ref[...], preferred_element_type=jnp.float32))

    # -------- wrapper glue: row padding + one-time constant/layout plumbing ----
    # 3 zero rows above + 1 below each image (period H+4): after the stride-2
    # row pool the garbage rows fall exactly on conv1's zero-padding positions.
    xrp = jnp.pad(x[:, 0], ((0, 0), (3, 1), (0, 0))).reshape(N * P0, W)

    w0k = _banded_conv_weight(params["w0"], W)       # (3, W,      C0*W)
    w1k = _banded_conv_weight(params["w1"], W2)      # (3, C0*W2,  C1*W2)
    b1row = jnp.repeat(params["b1"], W2)[None, :]    # (1, C1*W2)
    g_row = jnp.repeat(params["gamma"], W)[None, :]  # (1, C0*W)
    be_row = jnp.repeat(params["beta"], W)[None, :]  # (1, C0*W)

    lane = jnp.arange(C0 * W)
    selB = (lane[:, None] // W == lane[None, :] // W).astype(jnp.float32)  # (C0*W, C0*W)

    rm0 = _row_mask(M0, P0, 2, H + 1)     # valid conv0 output rows
    rm1 = _row_mask(CNT1, P1, 1, H2)      # valid pooled rows (others -> 0 pad)

    pe1, po1 = _col_selectors(C0 * W)     # (C0*W, C0*W2)
    pe2, po2 = _col_selectors(C1 * W2)    # (C1*W2, C1*W4)

    vmem = pl.BlockSpec(memory_space=pltpu.MemorySpace.VMEM)

    # TODO(synk): for large N/H/W add a grid over N ("parallel") with a BN
    # stats+apply split so both v7x TensorCores are used, and pad the output
    # lane dim to a multiple of 128 for unmasked stores.
    out = pl.pallas_call(
        kernel,
        out_shape=jax.ShapeDtypeStruct((CNT2, C1 * W4), jnp.float32),
        in_specs=[vmem] * 13,
        out_specs=vmem,
        scratch_shapes=[
            pltpu.VMEM((M0, C0 * W), jnp.float32),         # raw conv0 slab
            pltpu.VMEM((N * P1, C0 * W2), jnp.float32),    # padded conv1 input
            pltpu.VMEM((M1, C1 * W2), jnp.float32),        # conv1 + ReLU slab
        ],
    )(xrp, w0k, selB, g_row, be_row, rm0, pe1, po1, rm1, w1k, b1row, pe2, po2)

    # rows = n*(H4+1) + h (one garbage row per image dropped), lanes = c*W4 + w
    fo = jnp.pad(out, ((0, 1), (0, 0))).reshape(N, H4 + 1, C1, W4)
    return fo[:, :H4].transpose(0, 2, 1, 3)                 # (N, C1, H4, W4)


# ------------------------------ pure-JAX reference -----------------------------

def _reference(x, p):
    dn = ("NCHW", "OIHW", "NCHW")
    y = lax.conv_general_dilated(x, p["w0"], (1, 1), "SAME", dimension_numbers=dn)
    y = y + p["b0"][None, :, None, None]
    mean = jnp.mean(y, axis=(0, 2, 3), keepdims=True)
    var = jnp.mean((y - mean) ** 2, axis=(0, 2, 3), keepdims=True)
    y = (y - mean) / jnp.sqrt(var + 1e-5)
    y = y * p["gamma"][None, :, None, None] + p["beta"][None, :, None, None]
    y = jnp.maximum(y, 0.0)
    y = lax.reduce_window(y, -jnp.inf, lax.max, (1, 1, 2, 2), (1, 1, 2, 2), "VALID")
    y = lax.conv_general_dilated(y, p["w1"], (1, 1), "SAME", dimension_numbers=dn)
    y = y + p["b1"][None, :, None, None]
    y = jnp.maximum(y, 0.0)
    y = lax.reduce_window(y, -jnp.inf, lax.max, (1, 1, 2, 2), (1, 1, 2, 2), "VALID")
    return y


# ----------------------------------- main --------------------------------------

if __name__ == "__main__":
    key = jax.random.PRNGKey(0)
    kx, k0, kb0, kg, kbe, k1, kb1 = jax.random.split(key, 7)

    N, H, W = 2, 16, 16
    x = jax.random.normal(kx, (N, 1, H, W), dtype=jnp.float32)

    params = {
        "w0": 0.3 * jax.random.normal(k0, (3, 1, 3, 3), dtype=jnp.float32),
        "b0": 0.1 * jax.random.normal(kb0, (3,), dtype=jnp.float32),   # cancels in BN
        "gamma": 1.0 + 0.1 * jax.random.normal(kg, (3,), dtype=jnp.float32),
        "beta": 0.1 * jax.random.normal(kbe, (3,), dtype=jnp.float32),
        "w1": 0.2 * jax.random.normal(k1, (10, 3, 3, 3), dtype=jnp.float32),
        "b1": 0.1 * jax.random.normal(kb1, (10,), dtype=jnp.float32),
    }

    out = jax.block_until_ready(fe_cnn_1_forward(x, params))
    ref = jax.block_until_ready(_reference(x, params))

    assert out.shape == (N, 10, H // 4, W // 4), out.shape
    assert jnp.allclose(out, ref, atol=2e-4, rtol=2e-4), float(jnp.max(jnp.abs(out - ref)))
    print("KERNEL_OK")
</pallas_src>

<mosaic_0001>
module attributes {stable_mosaic.version = 11 : i64} {
  func.func @kernel(%arg0: memref<40x16xf32, #tpu.memory_space<vmem>>, %arg1: memref<3x16x48xf32, #tpu.memory_space<vmem>>, %arg2: memref<48x48xf32, #tpu.memory_space<vmem>>, %arg3: memref<1x48xf32, #tpu.memory_space<vmem>>, %arg4: memref<1x48xf32, #tpu.memory_space<vmem>>, %arg5: memref<38x1xf32, #tpu.memory_space<vmem>>, %arg6: memref<48x24xf32, #tpu.memory_space<vmem>>, %arg7: memref<48x24xf32, #tpu.memory_space<vmem>>, %arg8: memref<19x1xf32, #tpu.memory_space<vmem>>, %arg9: memref<3x24x80xf32, #tpu.memory_space<vmem>>, %arg10: memref<1x80xf32, #tpu.memory_space<vmem>>, %arg11: memref<80x40xf32, #tpu.memory_space<vmem>>, %arg12: memref<80x40xf32, #tpu.memory_space<vmem>>, %arg13: memref<9x40xf32, #tpu.memory_space<vmem>>, %arg14: memref<38x48xf32, #tpu.memory_space<vmem>>, %arg15: memref<20x24xf32, #tpu.memory_space<vmem>>, %arg16: memref<18x80xf32, #tpu.memory_space<vmem>>) attributes {dimension_semantics = [], scalar_prefetch = 0 : i64, scratch_operands = 3 : i64, tpu.core_type = #tpu.core_type<tc>} {
    %cst = arith.constant 0.000000e+00 : f32
    %0 = vector.broadcast %cst : f32 to vector<38x48xf32>
    %c0 = arith.constant 0 : index
    %c0_0 = arith.constant 0 : index
    %1 = vector.load %arg0[%c0, %c0_0] : memref<40x16xf32, #tpu.memory_space<vmem>>, vector<38x16xf32>
    %c0_1 = arith.constant 0 : index
    %c0_2 = arith.constant 0 : index
    %c0_3 = arith.constant 0 : index
    %2 = vector.load %arg1[%c0_1, %c0_2, %c0_3] : memref<3x16x48xf32, #tpu.memory_space<vmem>>, vector<1x16x48xf32>
    %3 = vector.shape_cast %2 : vector<1x16x48xf32> to vector<16x48xf32>
    %cst_4 = arith.constant dense<0.000000e+00> : vector<38x48xf32>
    %4 = tpu.matmul %1, %3, %cst_4 {dimension_numbers = #tpu.dot_dimension_numbers<[1], [0], [0], [1], [0, 0, 1, 1], [], []>} : vector<38x16xf32>, vector<16x48xf32>, vector<38x48xf32> -> vector<38x48xf32>
    %5 = arith.addf %0, %4 : vector<38x48xf32>
    %c1 = arith.constant 1 : index
    %c0_5 = arith.constant 0 : index
    %6 = vector.load %arg0[%c1, %c0_5] : memref<40x16xf32, #tpu.memory_space<vmem>>, vector<38x16xf32>
    %c1_6 = arith.constant 1 : index
    %c0_7 = arith.constant 0 : index
    %c0_8 = arith.constant 0 : index
    %7 = vector.load %arg1[%c1_6, %c0_7, %c0_8] : memref<3x16x48xf32, #tpu.memory_space<vmem>>, vector<1x16x48xf32>
    %8 = vector.shape_cast %7 : vector<1x16x48xf32> to vector<16x48xf32>
    %cst_9 = arith.constant dense<0.000000e+00> : vector<38x48xf32>
    %9 = tpu.matmul %6, %8, %cst_9 {dimension_numbers = #tpu.dot_dimension_numbers<[1], [0], [0], [1], [0, 0, 1, 1], [], []>} : vector<38x16xf32>, vector<16x48xf32>, vector<38x48xf32> -> vector<38x48xf32>
    %10 = arith.addf %5, %9 : vector<38x48xf32>
    %c2 = arith.constant 2 : index
    %c0_10 = arith.constant 0 : index
    %11 = vector.load %arg0[%c2, %c0_10] : memref<40x16xf32, #tpu.memory_space<vmem>>, vector<38x16xf32>
    %c2_11 = arith.constant 2 : index
    %c0_12 = arith.constant 0 : index
    %c0_13 = arith.constant 0 : index
    %12 = vector.load %arg1[%c2_11, %c0_12, %c0_13] : memref<3x16x48xf32, #tpu.memory_space<vmem>>, vector<1x16x48xf32>
    %13 = vector.shape_cast %12 : vector<1x16x48xf32> to vector<16x48xf32>
    %cst_14 = arith.constant dense<0.000000e+00> : vector<38x48xf32>
    %14 = tpu.matmul %11, %13, %cst_14 {dimension_numbers = #tpu.dot_dimension_numbers<[1], [0], [0], [1], [0, 0, 1, 1], [], []>} : vector<38x16xf32>, vector<16x48xf32>, vector<38x48xf32> -> vector<38x48xf32>
    %15 = arith.addf %10, %14 : vector<38x48xf32>
    %c0_15 = arith.constant 0 : index
    %c0_16 = arith.constant 0 : index
    %16 = vector.load %arg14[%c0_15, %c0_16] : memref<38x48xf32, #tpu.memory_space<vmem>>, vector<38x48xf32>
    tpu.vector_store %arg14[%c0_15, %c0_16], %15 {strides = array<i32>} : memref<38x48xf32, #tpu.memory_space<vmem>>, vector<38x48xf32>,
    %c0_17 = arith.constant 0 : index
    %c0_18 = arith.constant 0 : index
    %17 = vector.load %arg5[%c0_17, %c0_18] : memref<38x1xf32, #tpu.memory_space<vmem>>, vector<38x1xf32>
    %18 = vector.broadcast %17 : vector<38x1xf32> to vector<38x48xf32>
    %19 = arith.mulf %15, %18 : vector<38x48xf32>
    %cst_19 = arith.constant dense<0.000000e+00> : vector<48xf32>
    %20 = vector.multi_reduction <add>, %19, %cst_19 [0] : vector<38x48xf32> to vector<48xf32>
    %21 = vector.shape_cast %20 : vector<48xf32> to vector<1x48xf32>
    %22 = arith.mulf %19, %19 : vector<38x48xf32>
    %cst_20 = arith.constant dense<0.000000e+00> : vector<48xf32>
    %23 = vector.multi_reduction <add>, %22, %cst_20 [0] : vector<38x48xf32> to vector<48xf32>
    %24 = vector.shape_cast %23 : vector<48xf32> to vector<1x48xf32>
    %c0_21 = arith.constant 0 : index
    %c0_22 = arith.constant 0 : index
    %25 = vector.load %arg2[%c0_21, %c0_22] : memref<48x48xf32, #tpu.memory_space<vmem>>, vector<48x48xf32>
    %cst_23 = arith.constant dense<0.000000e+00> : vector<1x48xf32>
    %26 = tpu.matmul %21, %25, %cst_23 {dimension_numbers = #tpu.dot_dimension_numbers<[1], [0], [0], [1], [0, 0, 1, 1], [], []>} : vector<1x48xf32>, vector<48x48xf32>, vector<1x48xf32> -> vector<1x48xf32>
    %cst_24 = arith.constant 0.001953125 : f32
    %27 = vector.broadcast %cst_24 : f32 to vector<1x48xf32>
    %28 = arith.mulf %26, %27 : vector<1x48xf32>
    %c0_25 = arith.constant 0 : index
    %c0_26 = arith.constant 0 : index
    %29 = vector.load %arg2[%c0_25, %c0_26] : memref<48x48xf32, #tpu.memory_space<vmem>>, vector<48x48xf32>
    %cst_27 = arith.constant dense<0.000000e+00> : vector<1x48xf32>
    %30 = tpu.matmul %24, %29, %cst_27 {dimension_numbers = #tpu.dot_dimension_numbers<[1], [0], [0], [1], [0, 0, 1, 1], [], []>} : vector<1x48xf32>, vector<48x48xf32>, vector<1x48xf32> -> vector<1x48xf32>
    %cst_28 = arith.constant 0.001953125 : f32
    %31 = vector.broadcast %cst_28 : f32 to vector<1x48xf32>
    %32 = arith.mulf %30, %31 : vector<1x48xf32>
    %33 = arith.mulf %28, %28 : vector<1x48xf32>
    %34 = arith.subf %32, %33 : vector<1x48xf32>
    %c0_29 = arith.constant 0 : index
    %c0_30 = arith.constant 0 : index
    %35 = vector.load %arg3[%c0_29, %c0_30] : memref<1x48xf32, #tpu.memory_space<vmem>>, vector<1x48xf32>
    %cst_31 = arith.constant 9.99999974E-6 : f32
    %36 = vector.broadcast %cst_31 : f32 to vector<1x48xf32>
    %37 = arith.addf %34, %36 : vector<1x48xf32>
    %38 = math.rsqrt %37 : vector<1x48xf32>
    %39 = arith.mulf %35, %38 : vector<1x48xf32>
    %c0_32 = arith.constant 0 : index
    %c0_33 = arith.constant 0 : index
    %40 = vector.load %arg4[%c0_32, %c0_33] : memref<1x48xf32, #tpu.memory_space<vmem>>, vector<1x48xf32>
    %41 = arith.mulf %28, %39 : vector<1x48xf32>
    %42 = arith.subf %40, %41 : vector<1x48xf32>
    %c0_34 = arith.constant 0 : index
    %c0_35 = arith.constant 0 : index
    %43 = tpu.strided_load %arg14[%c0_34, %c0_35] {strides = array<i32: 2, 1>} : memref<38x48xf32, #tpu.memory_space<vmem>>, vector<19x48xf32>
    %44 = vector.broadcast %39 : vector<1x48xf32> to vector<19x48xf32>
    %45 = arith.mulf %43, %44 : vector<19x48xf32>
    %46 = vector.broadcast %42 : vector<1x48xf32> to vector<19x48xf32>
    %47 = arith.addf %45, %46 : vector<19x48xf32>
    %cst_36 = arith.constant 0.000000e+00 : f32
    %48 = vector.broadcast %cst_36 : f32 to vector<19x48xf32>
    %49 = arith.maximumf %47, %48 : vector<19x48xf32>
    %c1_37 = arith.constant 1 : index
    %c0_38 = arith.constant 0 : index
    %50 = tpu.strided_load %arg14[%c1_37, %c0_38] {strides = array<i32: 2, 1>} : memref<38x48xf32, #tpu.memory_space<vmem>>, vector<19x48xf32>
    %51 = vector.broadcast %39 : vector<1x48xf32> to vector<19x48xf32>
    %52 = arith.mulf %50, %51 : vector<19x48xf32>
    %53 = vector.broadcast %42 : vector<1x48xf32> to vector<19x48xf32>
    %54 = arith.addf %52, %53 : vector<19x48xf32>
    %cst_39 = arith.constant 0.000000e+00 : f32
    %55 = vector.broadcast %cst_39 : f32 to vector<19x48xf32>
    %56 = arith.maximumf %54, %55 : vector<19x48xf32>
    %57 = arith.maximumf %49, %56 : vector<19x48xf32>
    %c0_40 = arith.constant 0 : index
    %c0_41 = arith.constant 0 : index
    %58 = vector.load %arg6[%c0_40, %c0_41] : memref<48x24xf32, #tpu.memory_space<vmem>>, vector<48x24xf32>
    %cst_42 = arith.constant dense<0.000000e+00> : vector<19x24xf32>
    %59 = tpu.matmul %57, %58, %cst_42 {dimension_numbers = #tpu.dot_dimension_numbers<[1], [0], [0], [1], [0, 0, 1, 1], [], []>} : vector<19x48xf32>, vector<48x24xf32>, vector<19x24xf32> -> vector<19x24xf32>
    %c0_43 = arith.constant 0 : index
    %c0_44 = arith.constant 0 : index
    %60 = vector.load %arg7[%c0_43, %c0_44] : memref<48x24xf32, #tpu.memory_space<vmem>>, vector<48x24xf32>
    %cst_45 = arith.constant dense<0.000000e+00> : vector<19x24xf32>
    %61 = tpu.matmul %57, %60, %cst_45 {dimension_numbers = #tpu.dot_dimension_numbers<[1], [0], [0], [1], [0, 0, 1, 1], [], []>} : vector<19x48xf32>, vector<48x24xf32>, vector<19x24xf32> -> vector<19x24xf32>
    %62 = arith.maximumf %59, %61 : vector<19x24xf32>
    %c0_46 = arith.constant 0 : index
    %c0_47 = arith.constant 0 : index
    %63 = vector.load %arg8[%c0_46, %c0_47] : memref<19x1xf32, #tpu.memory_space<vmem>>, vector<19x1xf32>
    %64 = vector.broadcast %63 : vector<19x1xf32> to vector<19x24xf32>
    %65 = arith.mulf %62, %64 : vector<19x24xf32>
    %c0_48 = arith.constant 0 : index
    %c0_49 = arith.constant 0 : index
    %66 = vector.load %arg15[%c0_48, %c0_49] : memref<20x24xf32, #tpu.memory_space<vmem>>, vector<19x24xf32>
    tpu.vector_store %arg15[%c0_48, %c0_49], %65 {strides = array<i32>} : memref<20x24xf32, #tpu.memory_space<vmem>>, vector<19x24xf32>,
    %cst_50 = arith.constant 0.000000e+00 : f32
    %67 = vector.broadcast %cst_50 : f32 to vector<1x24xf32>
    %c19 = arith.constant 19 : index
    %c0_51 = arith.constant 0 : index
    %68 = vector.load %arg15[%c19, %c0_51] : memref<20x24xf32, #tpu.memory_space<vmem>>, vector<1x24xf32>
    tpu.vector_store %arg15[%c19, %c0_51], %67 {strides = array<i32>} : memref<20x24xf32, #tpu.memory_space<vmem>>, vector<1x24xf32>,
    %cst_52 = arith.constant 0.000000e+00 : f32
    %69 = vector.broadcast %cst_52 : f32 to vector<18x80xf32>
    %c0_53 = arith.constant 0 : index
    %c0_54 = arith.constant 0 : index
    %70 = vector.load %arg15[%c0_53, %c0_54] : memref<20x24xf32, #tpu.memory_space<vmem>>, vector<18x24xf32>
    %c0_55 = arith.constant 0 : index
    %c0_56 = arith.constant 0 : index
    %c0_57 = arith.constant 0 : index
    %71 = vector.load %arg9[%c0_55, %c0_56, %c0_57] : memref<3x24x80xf32, #tpu.memory_space<vmem>>, vector<1x24x80xf32>
    %72 = vector.shape_cast %71 : vector<1x24x80xf32> to vector<24x80xf32>
    %cst_58 = arith.constant dense<0.000000e+00> : vector<18x80xf32>
    %73 = tpu.matmul %70, %72, %cst_58 {dimension_numbers = #tpu.dot_dimension_numbers<[1], [0], [0], [1], [0, 0, 1, 1], [], []>} : vector<18x24xf32>, vector<24x80xf32>, vector<18x80xf32> -> vector<18x80xf32>
    %74 = arith.addf %69, %73 : vector<18x80xf32>
    %c1_59 = arith.constant 1 : index
    %c0_60 = arith.constant 0 : index
    %75 = vector.load %arg15[%c1_59, %c0_60] : memref<20x24xf32, #tpu.memory_space<vmem>>, vector<18x24xf32>
    %c1_61 = arith.constant 1 : index
    %c0_62 = arith.constant 0 : index
    %c0_63 = arith.constant 0 : index
    %76 = vector.load %arg9[%c1_61, %c0_62, %c0_63] : memref<3x24x80xf32, #tpu.memory_space<vmem>>, vector<1x24x80xf32>
    %77 = vector.shape_cast %76 : vector<1x24x80xf32> to vector<24x80xf32>
    %cst_64 = arith.constant dense<0.000000e+00> : vector<18x80xf32>
    %78 = tpu.matmul %75, %77, %cst_64 {dimension_numbers = #tpu.dot_dimension_numbers<[1], [0], [0], [1], [0, 0, 1, 1], [], []>} : vector<18x24xf32>, vector<24x80xf32>, vector<18x80xf32> -> vector<18x80xf32>
    %79 = arith.addf %74, %78 : vector<18x80xf32>
    %c2_65 = arith.constant 2 : index
    %c0_66 = arith.constant 0 : index
    %80 = vector.load %arg15[%c2_65, %c0_66] : memref<20x24xf32, #tpu.memory_space<vmem>>, vector<18x24xf32>
    %c2_67 = arith.constant 2 : index
    %c0_68 = arith.constant 0 : index
    %c0_69 = arith.constant 0 : index
    %81 = vector.load %arg9[%c2_67, %c0_68, %c0_69] : memref<3x24x80xf32, #tpu.memory_space<vmem>>, vector<1x24x80xf32>
    %82 = vector.shape_cast %81 : vector<1x24x80xf32> to vector<24x80xf32>
    %cst_70 = arith.constant dense<0.000000e+00> : vector<18x80xf32>
    %83 = tpu.matmul %80, %82, %cst_70 {dimension_numbers = #tpu.dot_dimension_numbers<[1], [0], [0], [1], [0, 0, 1, 1], [], []>} : vector<18x24xf32>, vector<24x80xf32>, vector<18x80xf32> -> vector<18x80xf32>
    %84 = arith.addf %79, %83 : vector<18x80xf32>
    %c0_71 = arith.constant 0 : index
    %c0_72 = arith.constant 0 : index
    %85 = vector.load %arg10[%c0_71, %c0_72] : memref<1x80xf32, #tpu.memory_space<vmem>>, vector<1x80xf32>
    %86 = vector.broadcast %85 : vector<1x80xf32> to vector<18x80xf32>
    %87 = arith.addf %84, %86 : vector<18x80xf32>
    %cst_73 = arith.constant 0.000000e+00 : f32
    %88 = vector.broadcast %cst_73 : f32 to vector<18x80xf32>
    %89 = arith.maximumf %87, %88 : vector<18x80xf32>
    %c0_74 = arith.constant 0 : index
    %c0_75 = arith.constant 0 : index
    %90 = vector.load %arg16[%c0_74, %c0_75] : memref<18x80xf32, #tpu.memory_space<vmem>>, vector<18x80xf32>
    tpu.vector_store %arg16[%c0_74, %c0_75], %89 {strides = array<i32>} : memref<18x80xf32, #tpu.memory_space<vmem>>, vector<18x80xf32>,
    %c0_76 = arith.constant 0 : index
    %c0_77 = arith.constant 0 : index
    %91 = tpu.strided_load %arg16[%c0_76, %c0_77] {strides = array<i32: 2, 1>} : memref<18x80xf32, #tpu.memory_space<vmem>>, vector<9x80xf32>
    %c1_78 = arith.constant 1 : index
    %c0_79 = arith.constant 0 : index
    %92 = tpu.strided_load %arg16[%c1_78, %c0_79] {strides = array<i32: 2, 1>} : memref<18x80xf32, #tpu.memory_space<vmem>>, vector<9x80xf32>
    %93 = arith.maximumf %91, %92 : vector<9x80xf32>
    %c0_80 = arith.constant 0 : index
    %c0_81 = arith.constant 0 : index
    %94 = vector.load %arg11[%c0_80, %c0_81] : memref<80x40xf32, #tpu.memory_space<vmem>>, vector<80x40xf32>
    %cst_82 = arith.constant dense<0.000000e+00> : vector<9x40xf32>
    %95 = tpu.matmul %93, %94, %cst_82 {dimension_numbers = #tpu.dot_dimension_numbers<[1], [0], [0], [1], [0, 0, 1, 1], [], []>} : vector<9x80xf32>, vector<80x40xf32>, vector<9x40xf32> -> vector<9x40xf32>
    %c0_83 = arith.constant 0 : index
    %c0_84 = arith.constant 0 : index
    %96 = vector.load %arg12[%c0_83, %c0_84] : memref<80x40xf32, #tpu.memory_space<vmem>>, vector<80x40xf32>
    %cst_85 = arith.constant dense<0.000000e+00> : vector<9x40xf32>
    %97 = tpu.matmul %93, %96, %cst_85 {dimension_numbers = #tpu.dot_dimension_numbers<[1], [0], [0], [1], [0, 0, 1, 1], [], []>} : vector<9x80xf32>, vector<80x40xf32>, vector<9x40xf32> -> vector<9x40xf32>
    %98 = arith.maximumf %95, %97 : vector<9x40xf32>
    %c0_86 = arith.constant 0 : index
    %c0_87 = arith.constant 0 : index
    %99 = vector.load %arg13[%c0_86, %c0_87] : memref<9x40xf32, #tpu.memory_space<vmem>>, vector<9x40xf32>
    tpu.vector_store %arg13[%c0_86, %c0_87], %98 {strides = array<i32>} : memref<9x40xf32, #tpu.memory_space<vmem>>, vector<9x40xf32>,
    return
  }
}

</mosaic_0001>

<bundles_post_ra>
// kernel: tpu_custom_call.1
= control target key start
LH: loop header
LB: loop body
LE: loop exit
PB: predicated region body
PF: predicated region fallthrough
CT: control target
= control target key end

     0   :  { %v1911_v2 = vmov 0.0|0.0   ;;  %vm1912_vm0 = vmmov 0   ;;  %v1913_v4 = vmov 0.0   ;;  %vm60_vm1 = vcmask 130048   ;;  %s2379_s0 = inlined_call_operand.vmem [shape: f32[40,16], index: 0, kind: input, shape index: {}]   ;;  %s2380_s1 = inlined_call_operand.vmem [shape: f32[3,16,48], index: 1, kind: input, shape index: {}]   ;;  %s2381_s2 = inlined_call_operand.vmem [shape: f32[48,48], index: 2, kind: input, shape index: {}]   ;;  %s2382_s3 = inlined_call_operand.vmem [shape: f32[1,48], index: 3, kind: input, shape index: {}]   ;;  %s2383_s4 = inlined_call_operand.vmem [shape: f32[1,48], index: 4, kind: input, shape index: {}]   ;;  %s2384_s5 = inlined_call_operand.vmem [shape: f32[38,1], index: 5, kind: input, shape index: {}]   ;;  %s2385_s6 = inlined_call_operand.vmem [shape: f32[48,24], index: 6, kind: input, shape index: {}]   ;;  %s2386_s7 = inlined_call_operand.vmem [shape: f32[48,24], index: 7, kind: input, shape index: {}]   ;;  %s2387_s8 = inlined_call_operand.vmem [shape: f32[19,1], index: 8, kind: input, shape index: {}]   ;;  %s2388_s9 = inlined_call_operand.vmem [shape: f32[3,24,80], index: 9, kind: input, shape index: {}]   ;;  %s2389_s10 = inlined_call_operand.vmem [shape: f32[1,80], index: 10, kind: input, shape index: {}]   ;;  %s2390_s11 = inlined_call_operand.vmem [shape: f32[80,40], index: 11, kind: input, shape index: {}]   ;;  %s2391_s12 = inlined_call_operand.vmem [shape: f32[80,40], index: 12, kind: input, shape index: {}]   ;;  %s2392_s13 = inlined_call_operand.hbm [shape: f32[9,40], index: 13, kind: output, shape index: {}]  }
   0x1   :  { %v1400_v0 = vld [vmem:[%s2380_s1 + $0x10] sm:$0xff]  ;;  %v1401_v1 = vld [vmem:[%s2380_s1 + $0x18] sm:$0xff]  ;;  %1762 = vmatprep.subr.bf16.mxu0 %v1911_v2  ;;  %1546 = vmatprep.mubr.msk.f32.mxu0 %vm1912_vm0, %v1913_v4  ;;  %v50_v5 = vld [vmem:[%s2380_s1] sm:$0xff]  ;;  %v1914_v11 = vmov 0  }
   0x2   :  { %v1763_v3 = vpack.c.bf16 %v1401_v1, %v1400_v0  ;;  %v51_v6 = vld [vmem:[%s2380_s1 + $0x8] sm:$0xff]  ;;  %1856 = vmatprep.subr.bf16.mxu1 %v1911_v2  ;;  %1593 = vmatprep.mubr.msk.f32.mxu1 %vm1912_vm0, %v1913_v4  ;;  %v1412_v9 = vld [vmem:[%s2380_s1 + $0x20] sm:$0xff]  ;;  %v398_v15 = vld [vmem:[%s2384_s5 + $0x10] sm:$0xff] }
   0x3   :  { %v52_v7 = vld [vmem:[%s2379_s0 + $0x1] sm:$0xff]  ;;  %v1766_v8 = vpack.c.bf16 %v51_v6, %v50_v5  ;;  %1884 = vset.pattern.permute.xlu1 %v1914_v11  ;;  %1883 = vset.pattern.permute.xlu0 %v1914_v11  ;;  %v53_v14 = vld [vmem:[%s2379_s0 + $0x9] sm:$0xff]  ;;  %v399_v17 = vld [vmem:[%s2384_s5 + $0x18] sm:$0xff] }
   0x4   :  { %1764 = vmatpush3.bf16.msra.mxu0 %v1763_v3  ;;  %v1413_v10 = vld [vmem:[%s2380_s1 + $0x28] sm:$0xff]  ;;  %v274_v13 = vld [vmem:[%s2379_s0 + $0x1a] sm:$0xff]  ;;  %413 = vperm.xlu1 %1884, %v398_v15  }
   0x5   :  { %1765 = vmatprep.subr.bf16.mxu0 %v1911_v2  ;;  %v1769_v12 = vpack.c.bf16 %v1413_v10, %v1412_v9  ;;  %v396_v16 = vld [vmem:[%s2384_s5] sm:$0xff] }
   0x6   :  { %403 = vperm.xlu0 %1883, %v396_v16  }
   0x7   :  { %1547 = vmatmul.mubr.msk.f32.vlgmr.msra.gmra.mrb[0].mxu0 %vm60_vm1, %v52_v7  ;;  %1857 = vmatpush3.bf16.msra.mxu1 %v1769_v12 }
   0x8   :  { %1767 = vmatpush3.bf16.msra.mxu0 %v1766_v8  ;;  %1549 = vmatprep.mubr.msk.f32.mxu0 %vm1912_vm0, %v1913_v4 }
   0x9   :  { %1768 = vmatprep.subr.bf16.mxu0 %v1911_v2 }
   0xa   :  { %1594 = vmatmul.mubr.msk.f32.vlgmr.msra.gmra.mrb[0].mxu1 %vm60_vm1, %v274_v13 }
   0xb   :  { %18 = vsyncpa [#allocation6], 0  ;;  %1550 = vmatmul.mubr.msk.f32.gmra.mrb[2].mxu0 %vm60_vm1, %v53_v14  ;;  %1596 = vmatprep.mubr.msk.f32.mxu1 %vm1912_vm0, %v1913_v4  ;;  %v275_v18 = vld [vmem:[%s2379_s0 + $0x22] sm:$0x3f]  ;;  %v397_v19 = vld [vmem:[%s2384_s5 + $0x8] sm:$0xff]  ;;  %vm389_vm2 = vcmask 392192  }
   0xc   :  { %1552 = vmatprep.mubr.msk.f32.mxu0 %vm1912_vm0, %v1913_v4  ;;  %v54_v20 = vld [vmem:[%s2379_s0 + $0x11] sm:$0xff]  ;;  %1780 = vmatprep.subr.bf16.mxu1 %v1911_v2  ;;  %v857_v21 = vld [vmem:[%s2387_s8] sm:$0xff]  ;;  %v858_v25 = vld [vmem:[%s2387_s8 + $0x8] sm:$0xff]  ;;  %vm394_vm3 = vcmask 390144   ;;  %vm883_vm4 = vcmask 188416   ;;  %vm878_vm5 = vcmask 195584  }
   0xd   :  { %418 = vperm.xlu1 %1884, %v399_v17   ;;  %408 = vperm.xlu0 %1883, %v397_v19   ;;  %v400_v22 = vld [vmem:[%s2384_s5 + $0x20] sm:$0x3f]  ;;  %v859_v24 = vld [vmem:[%s2387_s8 + $0x10] sm:$0x7]  ;;  %v46_v28 = vld [vmem:[%s2379_s0 + $0x8] sm:$0xff]  ;;  %vm881_vm6 = vcmask 190464  }
   0xe   :  { %1597 = vmatmul.mubr.msk.f32.gmra.mrb[2].mxu1 %vm60_vm1, %v275_v18  ;;  %v55_v23 = vld [vmem:[%s2379_s0 + $0x19] sm:$0xff]  ;;  %v56_v26 = vld [vmem:[%s2379_s0 + $0x21] sm:$0x3f]  ;;  %v47_v29 = vld [vmem:[%s2379_s0 + $0x10] sm:$0xff]  ;;  %884 = vst.msk [vmem:[#allocation3 + $0x13] sm:$0x1] %vm883_vm4, %v1913_v4 }
   0xf   :  { %1553 = vmatmul.mubr.msk.f32.gmra.mrb[4].mxu0 %vm60_vm1, %v54_v20  ;;  %1626 = vmatprep.mubr.msk.f32.mxu1 %vm1912_vm0, %v1913_v4  ;;  %v45_v27 = vld [vmem:[%s2379_s0] sm:$0xff]  ;;  %v48_v30 = vld [vmem:[%s2379_s0 + $0x18] sm:$0xff]  ;;  %v272_v33 = vld [vmem:[%s2379_s0 + $0xa] sm:$0xff]  ;;  %vm1188_vm7 = vcmask 654336   ;;  %vm1191_vm8 = vcmask 648192   ;;  %vm1382_vm9 = vcmask 319488  }
  0x10   :  { %1555 = vmatprep.mubr.msk.f32.mxu0 %vm1912_vm0, %v1913_v4  ;;  %v49_v31 = vld [vmem:[%s2379_s0 + $0x20] sm:$0x3f]  ;;  %v273_v34 = vld [vmem:[%s2379_s0 + $0x12] sm:$0xff]  ;;  %v467_v36 = vld [vmem:[%s2381_s2 + $0x8] sm:$0xff]  ;;  %vm1380_vm10 = vcmask 326656  }
  0x11   :  { %862 = vperm.xlu1 %1884, %v857_v21   ;;  %423 = vperm.xlu0 %1883, %v400_v22   ;;  %v271_v32 = vld [vmem:[%s2379_s0 + $0x2] sm:$0xff]  ;;  %v468_v38 = vld [vmem:[%s2381_s2 + $0x10] sm:$0xff]  ;;  %v469_v39 = vld [vmem:[%s2381_s2 + $0x18] sm:$0xff] }
  0x12   :  { %v466_v35 = vld [vmem:[%s2381_s2] sm:$0xff]  ;;  %v1775_v40 = vpack.c.bf16 %v469_v39, %v468_v38  ;;  %v471_v42 = vld [vmem:[%s2381_s2 + $0x28] sm:$0xff] }
  0x13   :  { %1556 = vmatmul.mubr.msk.f32.gmra.mrb[6].mxu0 %vm60_vm1, %v55_v23  ;;  %v1772_v37 = vpack.c.bf16 %v467_v36, %v466_v35  ;;  %v470_v41 = vld [vmem:[%s2381_s2 + $0x20] sm:$0xff] }
  0x14   :  { %1558 = vmatprep.mubr.msk.f32.mxu0 %vm1912_vm0, %v1913_v4  ;;  %v1778_v43 = vpack.c.bf16 %v471_v42, %v470_v41 }
  0x15   :  { %872 = vperm.xlu1 %1884, %v859_v24   ;;  %867 = vperm.xlu0 %1883, %v858_v25  }
  0x16   :  { %1782 = vmatpush3.bf16.msra.mxu1 %v1772_v37 }
  0x17   :  { %1559 = vmatmul.mubr.msk.f32.gmra.mrb[8].mxu0 %vm60_vm1, %v56_v26  ;;  %1783 = vmatprep.subr.bf16.mxu1 %v1911_v2 }
  0x18   :  { %1565 = vmatprep.mubr.msk.f32.mxu0 %vm1912_vm0, %v1913_v4 }
  0x1a   :  { %1785 = vmatpush3.bf16.msra.mxu1 %v1775_v40 }
  0x1b   :  { %1566 = vmatmul.mubr.msk.f32.vlgmr.msra.gmra.mrb[0].mxu0 %vm60_vm1, %v45_v27  ;;  %1786 = vmatprep.subr.bf16.mxu1 %v1911_v2 }
  0x1c   :  { %1770 = vmatpush3.bf16.msra.mxu0 %v1769_v12  ;;  %1568 = vmatprep.mubr.msk.f32.mxu0 %vm1912_vm0, %v1913_v4 }
  0x1d   :  { %1771 = vmatprep.subr.bf16.mxu0 %v1911_v2 }
  0x1e   :  { %1788 = vmatpush3.bf16.msra.mxu1 %v1778_v43 }
  0x1f   :  { %1569 = vmatmul.mubr.msk.f32.gmra.mrb[2].mxu0 %vm60_vm1, %v46_v28  ;;  %1789 = vmatprep.subr.bf16.mxu1 %v1911_v2 }
  0x20   :  { %1571 = vmatprep.mubr.msk.f32.mxu0 %vm1912_vm0, %v1913_v4 }
  0x23   :  { %1572 = vmatmul.mubr.msk.f32.gmra.mrb[4].mxu0 %vm60_vm1, %v47_v29 }
  0x24   :  { %1574 = vmatprep.mubr.msk.f32.mxu0 %vm1912_vm0, %v1913_v4 }
  0x27   :  { %1575 = vmatmul.mubr.msk.f32.gmra.mrb[6].mxu0 %vm60_vm1, %v48_v30 }
  0x28   :  { %1577 = vmatprep.mubr.msk.f32.mxu0 %vm1912_vm0, %v1913_v4 }
  0x2b   :  { %1578 = vmatmul.mubr.msk.f32.gmra.mrb[8].mxu0 %vm60_vm1, %v49_v31 }
  0x2c   :  { %1584 = vmatprep.mubr.msk.f32.mxu0 %vm1912_vm0, %v1913_v4 }
  0x2f   :  { %1585 = vmatmul.mubr.msk.f32.vlgmr.msra.gmra.mrb[0].mxu0 %vm60_vm1, %v271_v32 }
  0x30   :  { %1587 = vmatprep.mubr.msk.f32.mxu0 %vm1912_vm0, %v1913_v4  ;;  %1773 = vmatpush3.bf16.msra.mxu0 %v1772_v37 }
  0x31   :  { %1774 = vmatprep.subr.bf16.mxu0 %v1911_v2 }
  0x33   :  { %1588 = vmatmul.mubr.msk.f32.gmra.mrb[2].mxu0 %vm60_vm1, %v272_v33 }
  0x34   :  { %1590 = vmatprep.mubr.msk.f32.mxu0 %vm1912_vm0, %v1913_v4  ;;  %1776 = vmatpush3.bf16.msra.mxu0 %v1775_v40 }
  0x35   :  { %1777 = vmatprep.subr.bf16.mxu0 %v1911_v2 }
  0x37   :  { %1591 = vmatmul.mubr.msk.f32.gmra.mrb[4].mxu0 %vm60_vm1, %v273_v34 }
  0x38   :  { %1611 = vmatprep.mubr.msk.f32.mxu0 %vm1912_vm0, %v1913_v4  ;;  %1779 = vmatpush3.bf16.msra.mxu0 %v1778_v43  ;;  %v673_v43 = vld [vmem:[%s2385_s6] sm:$0xff] }
  0x39   :  { %1810 = vmatprep.subr.bf16.mxu0 %v1911_v2 }
  0x83   :  { %v414_v55 = vpop.permute.xlu1 %413 }
  0x85   :  { %v404_v51 = vpop.permute.xlu0 %403 }
  0x8c   :  { %v409_v56 = vpop.permute.xlu0 %408  ;;  %v419_v60 = vpop.permute.xlu1 %418 }
  0x90   :  { %v424_v1 = vpop.permute.xlu0 %423 }
  0xdd   :  { %v375_v44 = vpop.f32.mrb[0].mxu1 }
  0xde   :  { %v1595_v45 = vpop.f32.mrb[1].mxu1 }
  0xe1   :  { %v380_v46 = vpop.f32.mrb[2].mxu1 }
  0xe2   :  { %v1598_v47 = vpop.f32.mrb[3].mxu1 }
  0xe3   :  { %v676_v47 = vld [vmem:[%s2385_s6 + $0x18] sm:$0xff] }
  0xfa   :  { %v262_v48 = vpop.f32.mrb[6].mxu0 }
  0xfb   :  { %v1858_v49 = vadd.f32 %v375_v44, %v262_v48  ;;  %v1576_v50 = vpop.f32.mrb[7].mxu0  ;;  %v674_v44 = vld [vmem:[%s2385_s6 + $0x8] sm:$0xff] }
  0xfc   :  { %v1790_v45 = vpack.c.bf16 %v674_v44, %v673_v43  ;;  %v678_v50 = vld [vmem:[%s2385_s6 + $0x28] sm:$0xff]  ;;  %v772_v43 = vld [vmem:[%s2386_s7 + $0x20] sm:$0xff] }
  0xfd   :  { %393 = vst.msk [vmem:[#allocation2 + $0x18] sm:$0xff] %vm389_vm2, %v1858_v49  ;;  %v429_v3 = vmul.f32 %v1858_v49, %v419_v60  ;;  %v677_v49 = vld [vmem:[%s2385_s6 + $0x20] sm:$0xff]  ;;  %v773_v44 = vld [vmem:[%s2386_s7 + $0x28] sm:$0xff] }
  0xfe   :  { %v267_v52 = vpop.f32.mrb[8].mxu0 }
  0xff   :  { %v1859_v53 = vadd.f32 %v380_v46, %v267_v52  ;;  %v1579_v54 = vpop.f32.mrb[9].mxu0  ;;  %v449_v16 = vmul.f32 %v429_v3, %v429_v3  ;;  %v436_v20 = vsel %vm389_vm2, %v429_v3, 0.0  ;;  %v675_v46 = vld [vmem:[%s2385_s6 + $0x10] sm:$0xff] }
 0x100   :  { %v1793_v48 = vpack.c.bf16 %v676_v47, %v675_v46  ;;  %v888_v46 = vld [vmem:[%s2388_s9] sm:$0xff]  ;;  %v889_v47 = vld [vmem:[%s2388_s9 + $0x8] sm:$0xff] }
 0x101   :  { %395 = vst.msk [vmem:[#allocation2 + $0x20] sm:$0x3f] %vm394_vm3, %v1859_v53  ;;  %v430_v10 = vmul.f32 %v1859_v53, %v424_v1  ;;  %v456_v25 = vsel %vm389_vm2, %v449_v16, 0.0 }
 0x102   :  { %v360_v57 = vpop.f32.mrb[0].mxu0 }
 0x103   :  { %390 = vst.msk [vmem:[#allocation2] sm:$0xff] %vm389_vm2, %v360_v57  ;;  %v426_v58 = vmul.f32 %v404_v51, %v360_v57  ;;  %v1586_v59 = vpop.f32.mrb[1].mxu0  ;;  %v450_v21 = vmul.f32 %v430_v10, %v430_v10  ;;  %v438_v26 = vsel %vm394_vm3, %v430_v10, 0.0  ;;  %v1796_v51 = vpack.c.bf16 %v678_v50, %v677_v49  ;;  %v1427_v49 = vld [vmem:[%s2388_s9 + $0x18] sm:$0xff]  ;;  %v1428_v50 = vld [vmem:[%s2388_s9 + $0x20] sm:$0xff] }
 0x105   :  { %v446_v62 = vmul.f32 %v426_v58, %v426_v58  ;;  %v431_v5 = vsel %vm389_vm2, %v426_v58, 0.0  ;;  %v458_v29 = vsel %vm394_vm3, %v450_v21, 0.0 }
 0x106   :  { %v365_v61 = vpop.f32.mrb[2].mxu0 }
 0x107   :  { %391 = vst.msk [vmem:[#allocation2 + $0x8] sm:$0xff] %vm389_vm2, %v365_v61  ;;  %v427_v63 = vmul.f32 %v409_v56, %v365_v61  ;;  %v1589_v0 = vpop.f32.mrb[3].mxu0  ;;  %v451_v11 = vsel %vm389_vm2, %v446_v62, 0.0  ;;  %v635_v61 = vlaneseq }
 0x109   :  { %v432_v6 = vsel %vm389_vm2, %v427_v63, 0.0  ;;  %v447_v7 = vmul.f32 %v427_v63, %v427_v63  ;;  %v636_v62 = vshrl.u32 %v635_v61, 7  ;;  %v622_v63 = vld [vmem:[%s2382_s3] sm:$0x1] }
 0x10a   :  { %v433_v8 = vadd.f32 %v432_v6, %v431_v5  ;;  %v370_v9 = vpop.f32.mrb[4].mxu0  ;;  %v626_v5 = vld [vmem:[%s2383_s4] sm:$0x1] }
 0x10b   :  { %v452_v12 = vsel %vm389_vm2, %v447_v7, 0.0  ;;  %392 = vst.msk [vmem:[#allocation2 + $0x10] sm:$0xff] %vm389_vm2, %v370_v9  ;;  %v428_v13 = vmul.f32 %v414_v55, %v370_v9  ;;  %v1592_v14 = vpop.f32.mrb[5].mxu0  ;;  %v637_v0 = vsub.s32 0, %v636_v62 }
 0x10c   :  { %v453_v15 = vadd.f32 %v452_v12, %v451_v11 }
 0x10d   :  { %v434_v17 = vsel %vm389_vm2, %v428_v13, 0.0  ;;  %v448_v18 = vmul.f32 %v428_v13, %v428_v13 }
 0x10e   :  { %v435_v19 = vadd.f32 %v434_v17, %v433_v8  ;;  %v629_v9 = vld [vmem:[#allocation2] ss:$2 sm:$0xff]  ;;  %v656_v11 = vld [vmem:[#allocation2 + $0x1] ss:$2 sm:$0xff] }
 0x10f   :  { %v454_v22 = vsel %vm389_vm2, %v448_v18, 0.0  ;;  %v633_v18 = vld [vmem:[#allocation2 + $0x20] ss:$2 sm:$0x7] }
 0x110   :  { %v437_v23 = vadd.f32 %v436_v20, %v435_v19  ;;  %v455_v24 = vadd.f32 %v454_v22, %v453_v15  ;;  %v660_v19 = vld [vmem:[#allocation2 + $0x21] ss:$2 sm:$0x7] }
 0x112   :  { %v439_v27 = vadd.f32 %v438_v26, %v437_v23  ;;  %v457_v28 = vadd.f32 %v456_v25, %v455_v24  ;;  %v631_v12 = vld [vmem:[#allocation2 + $0x10] ss:$2 sm:$0xff]  ;;  %v658_v13 = vld [vmem:[#allocation2 + $0x11] ss:$2 sm:$0xff]  ;;  %v768_v24 = vld [vmem:[%s2386_s7] sm:$0xff] }
 0x113   :  { %v769_v25 = vld [vmem:[%s2386_s7 + $0x8] sm:$0xff] }
 0x114   :  { %v440_v30 = vrot.slane %v439_v27, 4  ;;  %v459_v31 = vadd.f32 %v458_v29, %v457_v28 }
 0x116   :  { %v441_v32 = vadd.f32 %v440_v30, %v439_v27  ;;  %v460_v33 = vrot.slane %v459_v31, 4 }
 0x118   :  { %v442_v34 = vrot.slane %v441_v32, 2  ;;  %v461_v35 = vadd.f32 %v460_v33, %v459_v31 }
 0x11a   :  { %v443_v36 = vadd.f32 %v442_v34, %v441_v32  ;;  %v462_v37 = vrot.slane %v461_v35, 2  ;;  %v1799_v34 = vpack.c.bf16 %v769_v25, %v768_v24  ;;  %v1202_v25 = vld [vmem:[%s2390_s11] sm:$0xff] }
 0x11c   :  { %v444_v38 = vrot.slane %v443_v36, 1  ;;  %v463_v39 = vadd.f32 %v462_v37, %v461_v35 }
 0x11e   :  { %v445_v40 = vadd.f32 %v444_v38, %v443_v36  ;;  %v464_v41 = vrot.slane %v463_v39, 1 }
 0x120   :  { %v465_v42 = vadd.f32 %v464_v41, %v463_v39  ;;  %1612 = vmatmul.mubr.msk.f32.vlgmr.msra.gmra.mrb[10].mxu0 %vm389_vm2, %v445_v40  ;;  %v770_v39 = vld [vmem:[%s2386_s7 + $0x10] sm:$0xff]  ;;  %v771_v40 = vld [vmem:[%s2386_s7 + $0x18] sm:$0xff] }
 0x121   :  { %1692 = vmatprep.mubr.msk.f32.mxu0 %vm1912_vm0, %v1913_v4 }
 0x122   :  { %1627 = vmatmul.mubr.msk.f32.vlgmr.msra.gmra.mrb[4].mxu1 %vm389_vm2, %v465_v42  ;;  %v1802_v42 = vpack.c.bf16 %v771_v40, %v770_v39  ;;  %v1298_v40 = vld [vmem:[%s2391_s12 + $0x28] sm:$0xff] }
 0x123   :  { %1641 = vmatprep.mubr.msk.f32.mxu1 %vm1912_vm0, %v1913_v4  ;;  %1791 = vmatpush3.bf16.msra.mxu1 %v1790_v45  ;;  %v1805_v45 = vpack.c.bf16 %v773_v44, %v772_v43  ;;  %v1209_v43 = vld [vmem:[%s2390_s11 + $0x38] sm:$0xff]  ;;  %v1299_v44 = vld [vmem:[%s2391_s12 + $0x30] sm:$0xff] }
 0x124   :  { %1792 = vmatprep.subr.bf16.mxu1 %v1911_v2 }
 0x127   :  { %1794 = vmatpush3.bf16.msra.mxu1 %v1793_v48  ;;  %v1811_v48 = vpack.c.bf16 %v889_v47, %v888_v46  ;;  %v1300_v46 = vld [vmem:[%s2391_s12 + $0x38] sm:$0xff]  ;;  %v1210_v47 = vld [vmem:[%s2390_s11 + $0x40] sm:$0xff] }
 0x128   :  { %1795 = vmatprep.subr.bf16.mxu1 %v1911_v2 }
 0x129   :  { %1812 = vmatpush3.bf16.msra.mxu0 %v1811_v48  ;;  %v1211_v48 = vld [vmem:[%s2390_s11 + $0x48] sm:$0xff] }
 0x12a   :  { %1690 = vmatprep.subr.mxu0 %v1913_v4 }
 0x12b   :  { %1797 = vmatpush3.bf16.msra.mxu1 %v1796_v51  ;;  %v1808_v51 = vpack.c.bf16 %v1428_v50, %v1427_v49  ;;  %v1848_v49 = vpack.c.bf16 %v1300_v46, %v1299_v44  ;;  %v1832_v50 = vpack.c.bf16 %v1211_v48, %v1210_v47 }
 0x12c   :  { %1798 = vmatprep.subr.bf16.mxu1 %v1911_v2 }
 0x1f3   :  { %v541_v52 = vpop.f32.mrb[10].mxu0 }
 0x1f4   :  { %v545_v53 = vmul.f32 0.001953125, %v541_v52  ;;  %v1613_v54 = vpop.f32.mrb[11].mxu0  ;;  %v890_v52 = vld [vmem:[%s2388_s9 + $0x10] sm:$0xff] }
 0x1f5   :  { %v615_v55 = vpop.f32.mrb[4].mxu1  ;;  %1691 = vmatpush3.msra.mxu0 %v890_v52  ;;  %v1302_v52 = vld [vmem:[%s2391_s12 + $0x48] sm:$0xff] }
 0x1f6   :  { %v620_v56 = vmul.f32 %v545_v53, %v545_v53  ;;  %v619_v57 = vmul.f32 0.001953125, %v615_v55  ;;  %v1628_v58 = vpop.f32.mrb[5].mxu1 }
 0x1f8   :  { %v621_v59 = vsub.f32 %v619_v57, %v620_v56 }
 0x1fa   :  { %v623_v60 = vadd.f32 1e-05, %v621_v59 }
 0x1fc   :  { %1885 = vrsqrt.f32 %v623_v60 }
 0x206   :  { %v1886_v1 = vpop.eup %1885 }
 0x207   :  { %v625_v3 = vmul.f32 %v1886_v1, %v622_v63  ;;  %v863_v63 = vpop.permute.xlu1 %862 }
 0x209   :  { %v627_v6 = vmul.f32 %v625_v3, %v545_v53  ;;  %v638_v7 = vrot.slane %v625_v3, %v637_v0  ;;  %v1429_v53 = vld [vmem:[%s2388_s9 + $0x28] sm:$0xff] }
 0x20b   :  { %v628_v8 = vsub.f32 %v626_v5, %v627_v6  ;;  %v640_v10 = vmul.f32 %v638_v7, %v629_v9  ;;  %v661_v15 = vmul.f32 %v656_v11, %v638_v7  ;;  %v641_v16 = vmul.f32 %v638_v7, %v631_v12  ;;  %v868_v6 = vpop.permute.xlu0 %867  ;;  %v1436_v12 = vld [vmem:[%s2388_s9 + $0x30] sm:$0xff] }
 0x20c   :  { %v662_v17 = vmul.f32 %v658_v13, %v638_v7  ;;  %v642_v20 = vmul.f32 %v638_v7, %v633_v18  ;;  %v663_v21 = vmul.f32 %v660_v19, %v638_v7  ;;  %v1437_v13 = vld [vmem:[%s2388_s9 + $0x38] sm:$0xff]  ;;  %v1438_v18 = vld [vmem:[%s2388_s9 + $0x40] sm:$0xff] }
 0x20d   :  { %v647_v14 = vrot.slane %v628_v8, %v637_v0 }
 0x20f   :  { %v649_v22 = vadd.f32 %v647_v14, %v640_v10  ;;  %v664_v23 = vadd.f32 %v661_v15, %v647_v14  ;;  %v650_v26 = vadd.f32 %v647_v14, %v641_v16  ;;  %v665_v27 = vadd.f32 %v662_v17, %v647_v14  ;;  %v873_v10 = vpop.permute.xlu1 %872 }
 0x210   :  { %v651_v28 = vadd.f32 %v647_v14, %v642_v20  ;;  %v666_v29 = vadd.f32 %v663_v21, %v647_v14  ;;  %v1814_v15 = vpack.c.bf16 %v1437_v13, %v1436_v12 }
 0x211   :  { %v652_v30 = vmax.f32 %v649_v22, 0.0  ;;  %v667_v31 = vmax.f32 %v664_v23, 0.0  ;;  %v653_v32 = vmax.f32 %v650_v26, 0.0  ;;  %v668_v33 = vmax.f32 %v665_v27, 0.0  ;;  %v1203_v26 = vld [vmem:[%s2390_s11 + $0x8] sm:$0xff]  ;;  %v1293_v27 = vld [vmem:[%s2391_s12] sm:$0xff] }
 0x212   :  { %v654_v35 = vmax.f32 %v651_v28, 0.0  ;;  %v669_v36 = vmax.f32 %v666_v29, 0.0  ;;  %v1816_v28 = vpack.c.bf16 %v1203_v26, %v1202_v25 }
 0x213   :  { %v670_v37 = vmax.f32 %v652_v30, %v667_v31  ;;  %v671_v38 = vmax.f32 %v653_v32, %v668_v33  ;;  %v1204_v30 = vld [vmem:[%s2390_s11 + $0x10] sm:$0xff]  ;;  %v1205_v31 = vld [vmem:[%s2390_s11 + $0x18] sm:$0xff] }
 0x214   :  { %v672_v41 = vmax.f32 %v654_v35, %v669_v36  ;;  %1817 = vmatprep.subr.bf16.mxu0 %v1816_v28  ;;  %v1295_v32 = vld [vmem:[%s2391_s12 + $0x10] sm:$0xff]  ;;  %v1820_v33 = vpack.c.bf16 %v1205_v31, %v1204_v30  ;;  %v1206_v36 = vld [vmem:[%s2390_s11 + $0x20] sm:$0xff] }
 0x215   :  { %1642 = vmatmul.mubr.msk.f32.vlgmr.msra.gmra.mrb[6].mxu1 %vm389_vm2, %v670_v37 }
 0x216   :  { %1800 = vmatpush3.bf16.msra.mxu1 %v1799_v34  ;;  %1644 = vmatprep.mubr.msk.f32.mxu1 %vm1912_vm0, %v1913_v4  ;;  %v1296_v34 = vld [vmem:[%s2391_s12 + $0x18] sm:$0xff] }
 0x217   :  { %1801 = vmatprep.subr.bf16.mxu1 %v1911_v2  ;;  %v1840_v35 = vpack.c.bf16 %v1296_v34, %v1295_v32 }
 0x219   :  { %1645 = vmatmul.mubr.msk.f32.gmra.mrb[8].mxu1 %vm389_vm2, %v671_v38 }
 0x21a   :  { %1803 = vmatpush3.bf16.msra.mxu1 %v1802_v42  ;;  %1647 = vmatprep.mubr.msk.f32.mxu1 %vm1912_vm0, %v1913_v4  ;;  %v1208_v42 = vld [vmem:[%s2390_s11 + $0x30] sm:$0xff] }
 0x21b   :  { %1804 = vmatprep.subr.bf16.mxu1 %v1911_v2 }
 0x21d   :  { %1648 = vmatmul.mubr.msk.f32.gmra.mrb[10].mxu1 %vm389_vm2, %v672_v41 }
 0x21e   :  { %1806 = vmatpush3.bf16.msra.mxu1 %v1805_v45  ;;  %1662 = vmatprep.mubr.msk.f32.mxu1 %vm1912_vm0, %v1913_v4  ;;  %v1828_v45 = vpack.c.bf16 %v1209_v43, %v1208_v42 }
 0x21f   :  { %1807 = vmatprep.subr.bf16.mxu1 %v1911_v2 }
 0x221   :  { %1663 = vmatmul.mubr.msk.f32.vlgmr.msra.gmra.mrb[12].mxu1 %vm389_vm2, %v670_v37  ;;  %v1207_v37 = vld [vmem:[%s2390_s11 + $0x28] sm:$0xff] }
 0x222   :  { %1665 = vmatprep.mubr.msk.f32.mxu1 %vm1912_vm0, %v1913_v4  ;;  %1809 = vmatpush3.bf16.msra.mxu1 %v1808_v51  ;;  %v1824_v39 = vpack.c.bf16 %v1207_v37, %v1206_v36  ;;  %v1301_v51 = vld [vmem:[%s2391_s12 + $0x40] sm:$0xff] }
 0x223   :  { %1675 = vmatprep.subr.mxu1 %v1913_v4 }
 0x225   :  { %1666 = vmatmul.mubr.msk.f32.gmra.mrb[14].mxu1 %vm389_vm2, %v671_v38  ;;  %v1297_v38 = vld [vmem:[%s2391_s12 + $0x20] sm:$0xff] }
 0x226   :  { %1668 = vmatprep.mubr.msk.f32.mxu1 %vm1912_vm0, %v1913_v4  ;;  %1676 = vmatpush3.msra.mxu1 %v1429_v53  ;;  %v1852_v53 = vpack.c.bf16 %v1302_v52, %v1301_v51 }
 0x227   :  { %1813 = vmatprep.subr.bf16.mxu1 %v1911_v2 }
 0x229   :  { %1669 = vmatmul.mubr.msk.f32.gmra.mrb[16].mxu1 %vm389_vm2, %v672_v41  ;;  %v1844_v41 = vpack.c.bf16 %v1298_v40, %v1297_v38 }
 0x22a   :  { %1677 = vmatprep.mubr.msk.f32.mxu1 %vm1912_vm0, %v1913_v4 }
 0x2e8   :  { %v754_v54 = vpop.f32.mrb[6].mxu1 }
 0x2e9   :  { %v1643_v55 = vpop.f32.mrb[7].mxu1 }
 0x2ec   :  { %v759_v56 = vpop.f32.mrb[8].mxu1 }
 0x2ed   :  { %v1646_v57 = vpop.f32.mrb[9].mxu1 }
 0x2f0   :  { %v764_v58 = vpop.f32.mrb[10].mxu1 }
 0x2f1   :  { %v1649_v59 = vpop.f32.mrb[11].mxu1 }
 0x2f4   :  { %v840_v60 = vpop.f32.mrb[12].mxu1 }
 0x2f5   :  { %v854_v61 = vmax.f32 %v754_v54, %v840_v60  ;;  %v1664_v62 = vpop.f32.mrb[13].mxu1 }
 0x2f7   :  { %v875_v0 = vmul.f32 %v863_v63, %v854_v61 }
 0x2f8   :  { %v845_v1 = vpop.f32.mrb[14].mxu1 }
 0x2f9   :  { %879 = vst.msk [vmem:[#allocation3] sm:$0xff] %vm878_vm5, %v875_v0  ;;  %v855_v3 = vmax.f32 %v759_v56, %v845_v1  ;;  %v1667_v5 = vpop.f32.mrb[15].mxu1 }
 0x2fb   :  { %v876_v7 = vmul.f32 %v868_v6, %v855_v3 }
 0x2fc   :  { %v850_v2 = vpop.f32.mrb[16].mxu1 }
 0x2fd   :  { %880 = vst.msk [vmem:[#allocation3 + $0x8] sm:$0xff] %vm878_vm5, %v876_v7  ;;  %v856_v8 = vmax.f32 %v764_v58, %v850_v2  ;;  %v1670_v9 = vpop.f32.mrb[17].mxu1  ;;  %v1442_v2 = vld [vmem:[%s2389_s10] ss:$0 sm:$0xff]  ;;  %s1915_s10 = smov [#allocation5]  }
 0x2fe   :  { %s1389_s24 = sshll.u32 %s1915_s10, 4  ;;  %s1390_s24 = int_to_ptr.vmem [resolvable:$true] %s1389_s24 }
 0x2ff   :  { %v877_v11 = vmul.f32 %v873_v10, %v856_v8  ;;  %s1887_s25 = scalar_lea.vmem %s1390_s24, 256  ;;  %p1892_p1 = scmp.lt.s32.totalorder %s1390_s24, %s1390_s24 }
 0x300   :  { %v885_v14 = vld [vmem:[#allocation3] sm:$0xff]  ;;  %p1888_p0 = scmp.ne.s32.totalorder %s1390_s24, %s1887_s25  ;;  %p1893_p2 = scmp.lt.s32.totalorder %s1887_s25, %s1887_s25 }
 0x301   :  { %882 = vst.msk [vmem:[#allocation3 + $0x10] sm:$0x7] %vm881_vm6, %v877_v11  ;;  %1693 = vmatmul.mubr.msk.f32.vlgmr.msra.gmra.mrb[12].mxu0 %vm878_vm5, %v885_v14 }
 0x302   :  { %1695 = vmatprep.mubr.msk.f32.mxu0 %vm1912_vm0, %v1913_v4  ;;  %1819 = vmatpush3.bf16.msra.mxu0 %v1816_v28  ;;  %p1894_p3 = por %p1893_p2, %p1892_p1 }
 0x303   :  { %1821 = vmatprep.subr.bf16.mxu0 %v1820_v33 }
 0x304   :  { %v891_v16 = vld [vmem:[#allocation3 + $0x1] sm:$0xff]  ;;  %p1895_p4 = pnand %p1894_p3, %p1888_p0 }
 0x305   :  { %v886_v17 = vld [vmem:[#allocation3 + $0x8] sm:$0xff]  ;;  %1678 = vmatmul.mubr.msk.f32.vlgmr.msra.gmra.mrb[18].mxu1 %vm878_vm5, %v891_v16 }
 0x306   :  { %1696 = vmatmul.mubr.msk.f32.gmra.mrb[14].mxu0 %vm878_vm5, %v886_v17  ;;  %1815 = vmatpush3.bf16.msra.mxu1 %v1814_v15  ;;  %v1076_v22 = vld [vmem:[#allocation3 + $0x2] sm:$0xff] }
 0x307   :  { %1680 = vmatprep.mubr.msk.f32.mxu1 %vm1912_vm0, %v1913_v4  ;;  %1698 = vmatprep.mubr.msk.f32.mxu0 %vm1912_vm0, %v1913_v4 }
 0x308   :  { %1705 = vmatprep.subr.mxu1 %v1913_v4  ;;  %v892_v19 = vld [vmem:[#allocation3 + $0x9] sm:$0xff]  ;;  %v893_v21 = vld [vmem:[#allocation3 + $0x11] sm:$0x3]  ;;  %1823 = vmatpush3.bf16.msra.mxu0 %v1820_v33 }
 0x309   :  { %v887_v20 = vld [vmem:[#allocation3 + $0x10] sm:$0x3]  ;;  %1681 = vmatmul.mubr.msk.f32.gmra.mrb[20].mxu1 %vm878_vm5, %v892_v19  ;;  %v1078_v24 = vld [vmem:[#allocation3 + $0x12] sm:$0x3]  ;;  %1825 = vmatprep.subr.bf16.mxu0 %v1824_v39 }
 0x30a   :  { %1699 = vmatmul.mubr.msk.f32.gmra.mrb[16].mxu0 %vm878_vm5, %v887_v20  ;;  %1683 = vmatprep.mubr.msk.f32.mxu1 %vm1912_vm0, %v1913_v4  ;;  %v1077_v23 = vld [vmem:[#allocation3 + $0xa] sm:$0xff] }
 0x30b   :  { %1706 = vmatpush3.msra.mxu1 %v1438_v18 }
 0x30c   :  { %1827 = vmatpush3.bf16.msra.mxu0 %v1824_v39 }
 0x30d   :  { %1684 = vmatmul.mubr.msk.f32.gmra.mrb[22].mxu1 %vm878_vm5, %v893_v21  ;;  %1829 = vmatprep.subr.bf16.mxu0 %v1828_v45 }
 0x30e   :  { %1707 = vmatprep.mubr.msk.f32.mxu1 %vm1912_vm0, %v1913_v4 }
 0x310   :  { %1831 = vmatpush3.bf16.msra.mxu0 %v1828_v45 }
 0x311   :  { %1708 = vmatmul.mubr.msk.f32.vlgmr.msra.gmra.mrb[24].mxu1 %vm878_vm5, %v1076_v22  ;;  %1833 = vmatprep.subr.bf16.mxu0 %v1832_v50 }
 0x312   :  { %1710 = vmatprep.mubr.msk.f32.mxu1 %vm1912_vm0, %v1913_v4 }
 0x314   :  { %1835 = vmatpush3.bf16.msra.mxu0 %v1832_v50 }
 0x315   :  { %1711 = vmatmul.mubr.msk.f32.gmra.mrb[26].mxu1 %vm878_vm5, %v1077_v23 }
 0x316   :  { %1713 = vmatprep.mubr.msk.f32.mxu1 %vm1912_vm0, %v1913_v4  ;;  %v1294_v4 = vld [vmem:[%s2391_s12 + $0x8] sm:$0xff] }
 0x317   :  { %v1836_v29 = vpack.c.bf16 %v1294_v4, %v1293_v27 }
 0x319   :  { %1714 = vmatmul.mubr.msk.f32.gmra.mrb[28].mxu1 %vm878_vm5, %v1078_v24  ;;  %1837 = vmatprep.subr.bf16.mxu1 %v1836_v29 }
 0x31a   :  { %1839 = vmatpush3.bf16.msra.mxu1 %v1836_v29 }
 0x31b   :  { %1841 = vmatprep.subr.bf16.mxu1 %v1840_v35 }
 0x31e   :  { %1843 = vmatpush3.bf16.msra.mxu1 %v1840_v35 }
 0x31f   :  { %1845 = vmatprep.subr.bf16.mxu1 %v1844_v41 }
 0x322   :  { %1847 = vmatpush3.bf16.msra.mxu1 %v1844_v41 }
 0x323   :  { %1849 = vmatprep.subr.bf16.mxu1 %v1848_v49 }
 0x326   :  { %1851 = vmatpush3.bf16.msra.mxu1 %v1848_v49 }
 0x327   :  { %1853 = vmatprep.subr.bf16.mxu1 %v1852_v53 }
 0x32a   :  { %1855 = vmatpush3.bf16.msra.mxu1 %v1852_v53 }
 0x3d4   :  { %v1062_v54 = vpop.f32.mrb[12].mxu0 }
 0x3d5   :  { %v1694_v55 = vpop.f32.mrb[13].mxu0 }
 0x3d8   :  { %v973_v56 = vpop.f32.mrb[18].mxu1 }
 0x3d9   :  { %v1067_v57 = vpop.f32.mrb[14].mxu0  ;;  %v1063_v58 = vadd.f32 %v1062_v54, %v973_v56  ;;  %v1679_v59 = vpop.f32.mrb[19].mxu1 }
 0x3da   :  { %v1697_v60 = vpop.f32.mrb[15].mxu0 }
 0x3dc   :  { %v978_v61 = vpop.f32.mrb[20].mxu1 }
 0x3dd   :  { %v1072_v62 = vpop.f32.mrb[16].mxu0  ;;  %v1068_v63 = vadd.f32 %v1067_v57, %v978_v61  ;;  %v1682_v0 = vpop.f32.mrb[21].mxu1 }
 0x3de   :  { %v1700_v1 = vpop.f32.mrb[17].mxu0 }
 0x3e0   :  { %v983_v3 = vpop.f32.mrb[22].mxu1 }
 0x3e1   :  { %v1073_v5 = vadd.f32 %v1072_v62, %v983_v3  ;;  %v1685_v6 = vpop.f32.mrb[23].mxu1 }
 0x3e4   :  { %v1158_v7 = vpop.f32.mrb[24].mxu1 }
 0x3e5   :  { %v1172_v8 = vadd.f32 %v1158_v7, %v1063_v58  ;;  %v1709_v9 = vpop.f32.mrb[25].mxu1 }
 0x3e7   :  { %v1182_v10 = vadd.f32 %v1442_v2, %v1172_v8 }
 0x3e8   :  { %v1163_v11 = vpop.f32.mrb[26].mxu1 }
 0x3e9   :  { %v1185_v12 = vmax.f32 %v1182_v10, 0.0  ;;  %v1173_v13 = vadd.f32 %v1163_v11, %v1068_v63  ;;  %v1712_v14 = vpop.f32.mrb[27].mxu1 }
 0x3eb   :  { %1189 = vst.msk [vmem:[#allocation4] sm:$0xff] %vm1188_vm7, %v1185_v12  ;;  %v1183_v15 = vadd.f32 %v1442_v2, %v1173_v13 }
 0x3ec   :  { %v1168_v16 = vpop.f32.mrb[28].mxu1 }
 0x3ed   :  { %v1186_v17 = vmax.f32 %v1183_v15, 0.0  ;;  %v1174_v18 = vadd.f32 %v1168_v16, %v1073_v5  ;;  %v1715_v19 = vpop.f32.mrb[29].mxu1 }
 0x3ef   :  { %1190 = vst.msk [vmem:[#allocation4 + $0x8] sm:$0xff] %vm1188_vm7, %v1186_v17  ;;  %v1184_v20 = vadd.f32 %v1442_v2, %v1174_v18 }
 0x3f1   :  { %v1187_v21 = vmax.f32 %v1184_v20, 0.0 }
 0x3f3   :  { %1192 = vst.msk [vmem:[#allocation4 + $0x10] sm:$0x3] %vm1191_vm8, %v1187_v21 }
 0x3f6   :  { %v1193_v22 = vld [vmem:[#allocation4] ss:$2 sm:$0xff]  ;;  %v1197_v23 = vld [vmem:[#allocation4 + $0x1] ss:$2 sm:$0xff] }
 0x3f7   :  { %v1200_v24 = vmax.f32 %v1193_v22, %v1197_v23 }
 0x3f9   :  { %1736 = vmatprep.mubr.msk.f32.mxu0 %vm1188_vm7, %v1200_v24  ;;  %1759 = vmatprep.mubr.msk.f32.mxu1 %vm1188_vm7, %v1200_v24 }
 0x3fa   :  { %v1195_v25 = vld [vmem:[#allocation4 + $0x10] ss:$2 sm:$0x1]  ;;  %v1199_v26 = vld [vmem:[#allocation4 + $0x11] ss:$2 sm:$0x1] }
 0x3fb   :  { %v1201_v27 = vmax.f32 %v1195_v25, %v1199_v26 }
 0x3fd   :  { %1737 = vmatmul.mubr.msk.f32.vlgmr.msra.gmra.mrb[18].mxu0 %vm1188_vm7, %v1201_v27  ;;  %1760 = vmatmul.mubr.msk.f32.vlgmr.msra.gmra.mrb[30].mxu1 %vm1188_vm7, %v1201_v27 }
 0x4d0   :  { %v1738_v28 = vpop.f32.mrb[18].mxu0  ;;  %v1761_v4 = vpop.f32.mrb[30].mxu1 }
 0x4d1   :  { %v1379_v29 = vmax.f32 %v1738_v28, %v1761_v4  ;;  %v1284_v30 = vpop.f32.mrb[19].mxu0  ;;  %v1369_v31 = vpop.f32.mrb[31].mxu1 }
 0x4d2   :  { %v1378_v32 = vmax.f32 %v1284_v30, %v1369_v31 }
 0x4d3   :  { %1383 = vst.msk [vmem:[#allocation5 + $0x8] sm:$0x1] %vm1382_vm9, %v1379_v29 }
 0x4d4   :  { %1381 = vst.msk [vmem:[#allocation5] sm:$0xff] %vm1380_vm10, %v1378_v32 }
 0x4d5   :  { %1898 = shalt.err (!%p1895_p4)
}
 0x4d6   :  { %s1899_s27 = scalar_lea.hbm %s2392_s13, 256 }
 0x4d7   :  { %p1900_p5 = scmp.ne.s32.totalorder %s2392_s13, %s1899_s27  ;;  %p1903_p6 = scmp.lt.u32.totalorder %s1899_s27, %s2392_s13 }
 0x4d9   :  { %p1905_p7 = pnand %p1903_p6, %p1900_p5 }
 0x4db   :  { %1908 = shalt.err (!%p1905_p7)
}
 0x4dc   :  { %s1916_s30 = smov 128   ;;  %s1917_s3 = smov 8  }
 0x4dd   :  { %1395 = dma.vmem_to_hbm [thread:$0]  %s1390_s24, 256, %s2392_s13, [#allocation6], %s1916_s30, %s1916_s30, %s1917_s3  }
 0x4de   :  { %1909 = dma.done.wait [#allocation6], 256  }
 0x4df   :  { %1910 = vsyncadd [#allocation6], 4294967040 }
 0x4e0   :  { %1399 = vsyncpa [#allocation6], 1 }

</bundles_post_ra>
